<compile_context>
chip_gen: v7x
topology: tpu7x:2x2x1
jax: 0.10.0
libtpu: 0.0.40
codegen_flags: <defaults>
</compile_context>

<pallas_src>
import math
import functools

import jax
import jax.numpy as jnp
from jax.experimental import pallas as pl
from jax.experimental.pallas import tpu as pltpu


# ---------------------------------------------------------------------------
# In-kernel helpers
# ---------------------------------------------------------------------------
def _gate_from_mean(mean_c1, w_ref, *, C, K, use_sigmoid):
    """K-tap channel conv (zero padding) + gate nonlinearity.

    mean_c1: (C, 1) f32 pooled means with the channel axis on sublanes.
    Cross-correlation (PyTorch Conv1d): conv[c] = sum_j w[j] * mean[c+j-pad],
    implemented as K sublane rolls + iota-masked scalar-weighted adds.
    """
    pad = K // 2
    idx = jax.lax.broadcasted_iota(jnp.int32, (C, 1), 0)
    conv = jnp.zeros((C, 1), jnp.float32)
    for j in range(K):                       # K is tiny & static -> unrolled
        d = j - pad                          # want shifted[c] = mean[c + d]
        if d == 0:
            shifted = mean_c1
        else:
            # pltpu.roll follows jnp.roll semantics: out[i] = in[(i - s) % C],
            # so s = (-d) mod C gives out[c] = mean[(c + d) mod C].
            shifted = pltpu.roll(mean_c1, (-d) % C, 0)
        valid = jnp.logical_and(idx + d >= 0, idx + d < C)   # zero padding
        conv = conv + w_ref[j] * jnp.where(valid, shifted, 0.0)
    if use_sigmoid:
        return jax.nn.sigmoid(conv)
    return jnp.clip(conv + 3.0, 0.0, 6.0) * (1.0 / 6.0)      # h_sigmoid


def _eca_fused_kernel(x_ref, w_ref, o_ref, *, C, HW, K, use_sigmoid):
    """Single-pass path: pool + conv + gate + apply for one batch element."""
    x = x_ref[0]                                             # (C, HW), native dtype
    # Pooling accumulates in f32; elementwise apply stays in the input dtype.
    mean = jnp.sum(x.astype(jnp.float32), axis=1, keepdims=True) * (1.0 / HW)
    gate = _gate_from_mean(mean, w_ref, C=C, K=K, use_sigmoid=use_sigmoid)
    o_ref[0] = (x * gate.astype(x.dtype)).astype(o_ref.dtype)


def _eca_pool_kernel(x_ref, w_ref, gate_ref, acc_ref, *, C, HW, K, hw_tile,
                     use_sigmoid):
    """Tiled phase 0: accumulate per-channel sums; emit the gate at last tile."""
    t = pl.program_id(1)

    @pl.when(t == 0)
    def _():
        acc_ref[...] = jnp.zeros_like(acc_ref)

    x = x_ref[0].astype(jnp.float32)                         # (C, hw_tile)
    if HW % hw_tile != 0:
        # Mask out-of-bounds lanes of the final (partial) tile.
        lane = jax.lax.broadcasted_iota(jnp.int32, (C, hw_tile), 1)
        x = jnp.where(lane < (HW - t * hw_tile), x, 0.0)
    acc_ref[...] += jnp.sum(x, axis=1, keepdims=True)        # (C, 1)

    @pl.when(t == pl.num_programs(1) - 1)
    def _():
        mean = acc_ref[...] * (1.0 / HW)
        gate_ref[0] = _gate_from_mean(mean, w_ref, C=C, K=K,
                                      use_sigmoid=use_sigmoid)


def _eca_apply_kernel(x_ref, gate_ref, o_ref):
    """Tiled phase 1: apply the per-channel gate to one HW tile (native dtype)."""
    x = x_ref[0]                                             # (C, hw_tile)
    o_ref[0] = (x * gate_ref[0].astype(x.dtype)).astype(o_ref.dtype)


# ---------------------------------------------------------------------------
# Wrapper helpers
# ---------------------------------------------------------------------------
def _vmem_capacity_bytes():
    """Physical VMEM size (generation-aware budgets); conservative fallback."""
    try:
        info = pltpu.get_tpu_info()
        for name in ("vmem_capacity_bytes", "vmem_size_bytes", "vmem_bytes"):
            v = getattr(info, name, None)
            if v:
                return int(v)
    except Exception:
        pass
    return 64 * 1024 * 1024      # v7x physical size -- safe on every generation


def _pick_hw_tile(HW, bytes_per_lane, budget_bytes):
    """Largest multiple-of-128 HW tile whose per-step footprint fits budget.

    bytes_per_lane: per-step VMEM bytes contributed by one HW element
    (double-buffered blocks + in-kernel temps).  An exact divisor of HW is
    only preferred when it is at least half of the budget-limited maximum, so
    HW = 128*prime takes a near-max tile with one masked ragged edge tile.
    """
    if HW <= 512:
        return HW
    max_rows = max(128, (budget_bytes // max(bytes_per_lane, 1)) // 128 * 128)
    max_rows = min(max_rows, ((HW + 127) // 128) * 128)
    if HW % 128 == 0:
        best = None
        for cand in range(128, min(HW, max_rows) + 1, 128):
            if HW % cand == 0:
                best = cand
        if best is not None and best * 2 >= max_rows:
            return best
    return int(max_rows)


# ---------------------------------------------------------------------------
# Wrapper
# ---------------------------------------------------------------------------
def eca_layer(x_nchw, conv_weight, *, sigmoid=True, force_tiled=False,
              force_fused=False, hw_tile=None):
    """ECALayer forward.  x_nchw: (B, C, H, W); conv_weight: (K,) Conv1d taps."""
    B, C, H, W = x_nchw.shape
    HW = H * W
    K = int(conv_weight.shape[0])
    itemsize = jnp.dtype(x_nchw.dtype).itemsize

    x = x_nchw.reshape(B, C, HW)             # metadata-only reshape (no copy)
    w = conv_weight.astype(jnp.float32)
    smem_spec = pl.BlockSpec(memory_space=pltpu.MemorySpace.SMEM)

    vmem_cap = _vmem_capacity_bytes()

    # Fused per-batch footprint: double-buffered in + out blocks, plus the f32
    # pooling temp and the product temp.
    fused_bytes = C * HW * (4 * itemsize + 4 + itemsize)
    fused_budget = int(0.40 * vmem_cap)
    fused_limit = int(min(0.85 * vmem_cap,
                          max(32 * 1024 * 1024, fused_bytes + 8 * 1024 * 1024)))

    # Tiled-path scoped limit / per-step budget (v7x ~32/16 MiB, 128 MiB parts
    # ~64/32 MiB).
    tiled_limit = int(min(0.50 * vmem_cap, 64 * 1024 * 1024))
    step_budget = tiled_limit // 2

    # Apply pass double-buffers in + out (+ product temp); pool pass only
    # double-buffers its input (+ f32 temp), so it can take a ~2x larger tile.
    apply_tile = hw_tile or _pick_hw_tile(HW, C * (4 * itemsize + itemsize),
                                          step_budget)
    pool_tile = hw_tile or _pick_hw_tile(HW, C * (2 * itemsize + 4),
                                         step_budget)

    # Fused path: lowest HBM traffic (1R + 1W), but grid=(B,) -> only B
    # pipeline steps.  Prefer it when the slab fits AND either B is deep
    # enough or tiling would not add meaningful pipeline depth anyway.
    t_apply = pl.cdiv(HW, apply_tile)
    fits_fused = fused_bytes <= fused_budget
    deep_enough = (B >= 4) or (t_apply <= 2)
    use_fused = (not force_tiled) and fits_fused and (force_fused or deep_enough)

    if use_fused:
        kernel = functools.partial(_eca_fused_kernel, C=C, HW=HW, K=K,
                                   use_sigmoid=sigmoid)
        out = pl.pallas_call(
            kernel,
            out_shape=jax.ShapeDtypeStruct((B, C, HW), x.dtype),
            grid_spec=pltpu.PrefetchScalarGridSpec(
                num_scalar_prefetch=0,
                grid=(B,),
                in_specs=[pl.BlockSpec((1, C, HW), lambda b: (b, 0, 0)),
                          smem_spec],
                out_specs=pl.BlockSpec((1, C, HW), lambda b: (b, 0, 0)),
            ),
            compiler_params=pltpu.CompilerParams(
                dimension_semantics=("parallel",),
                vmem_limit_bytes=fused_limit),
        )(x, w)
        return out.reshape(B, C, H, W)

    # Tiled two-phase path: bounded VMEM per step, pipeline depth B*T.
    t_pool = pl.cdiv(HW, pool_tile)

    pool_kernel = functools.partial(_eca_pool_kernel, C=C, HW=HW, K=K,
                                    hw_tile=pool_tile, use_sigmoid=sigmoid)
    gate = pl.pallas_call(
        pool_kernel,
        out_shape=jax.ShapeDtypeStruct((B, C, 1), jnp.float32),
        grid_spec=pltpu.PrefetchScalarGridSpec(
            num_scalar_prefetch=0,
            grid=(B, t_pool),
            in_specs=[pl.BlockSpec((1, C, pool_tile), lambda b, t: (b, 0, t)),
                      smem_spec],
            out_specs=pl.BlockSpec((1, C, 1), lambda b, t: (b, 0, 0)),
            scratch_shapes=[pltpu.VMEM((C, 1), jnp.float32)],
        ),
        compiler_params=pltpu.CompilerParams(
            dimension_semantics=("parallel", "arbitrary"),
            vmem_limit_bytes=tiled_limit),
    )(x, w)

    out = pl.pallas_call(
        _eca_apply_kernel,
        out_shape=jax.ShapeDtypeStruct((B, C, HW), x.dtype),
        grid_spec=pltpu.PrefetchScalarGridSpec(
            num_scalar_prefetch=0,
            grid=(B, t_apply),
            in_specs=[pl.BlockSpec((1, C, apply_tile), lambda b, t: (b, 0, t)),
                      pl.BlockSpec((1, C, 1), lambda b, t: (b, 0, 0))],
            out_specs=pl.BlockSpec((1, C, apply_tile), lambda b, t: (b, 0, t)),
        ),
        compiler_params=pltpu.CompilerParams(
            dimension_semantics=("parallel", "parallel"),
            vmem_limit_bytes=tiled_limit),
    )(x, gate)
    return out.reshape(B, C, H, W)


# ---------------------------------------------------------------------------
# Pure-JAX reference (mirrors the PyTorch module)
# ---------------------------------------------------------------------------
def eca_reference(x_nchw, conv_weight, *, sigmoid=True):
    B, C, H, W = x_nchw.shape
    K = conv_weight.shape[0]
    pad = K // 2
    y = jnp.mean(x_nchw.astype(jnp.float32), axis=(2, 3))       # (B, C)
    y_pad = jnp.pad(y, ((0, 0), (pad, pad)))
    conv = jnp.zeros_like(y)
    for j in range(K):
        conv = conv + conv_weight[j] * y_pad[:, j:j + C]
    if sigmoid:
        s = jax.nn.sigmoid(conv)
    else:
        s = jnp.clip(conv + 3.0, 0.0, 6.0) / 6.0
    return (x_nchw.astype(jnp.float32) * s[:, :, None, None]).astype(x_nchw.dtype)


if __name__ == "__main__":
    # Module config: channel=16  =>  t = int(|log2(16)+1| / 2) = 2  ->  k = 3
    B, C, H, W = 2, 16, 16, 16
    gamma, b_ = 2, 1
    t_ = int(abs((math.log(C, 2) + b_) / gamma))
    K = t_ if t_ % 2 else t_ + 1   # = 3

    key = jax.random.PRNGKey(0)
    kx, kw = jax.random.split(key)
    x = jax.random.normal(kx, (B, C, H, W), dtype=jnp.float32)

    # Deterministic Conv1d(1, 1, K, bias=False) weight (kaiming-uniform-like range).
    bound = 1.0 / math.sqrt(K)
    conv_weight = jax.random.uniform(kw, (K,), minval=-bound, maxval=bound,
                                     dtype=jnp.float32)

    ref = eca_reference(x, conv_weight)

    # Fused single-pass path (small feature map fits VMEM).
    out = jax.block_until_ready(eca_layer(x, conv_weight, force_fused=True))
    assert out.shape == (B, C, H, W)
    assert jnp.allclose(out, ref, atol=1e-5, rtol=1e-5), "fused path mismatch"

    # h_sigmoid variant of the fused path.
    ref_h = eca_reference(x, conv_weight, sigmoid=False)
    out_h = jax.block_until_ready(
        eca_layer(x, conv_weight, sigmoid=False, force_fused=True))
    assert jnp.allclose(out_h, ref_h, atol=1e-5, rtol=1e-5), "h_sigmoid mismatch"

    # Tiled two-phase path (HW tiled -> multi-step channel-sum accumulation).
    out_t = jax.block_until_ready(
        eca_layer(x, conv_weight, force_tiled=True, hw_tile=128))
    assert jnp.allclose(out_t, ref, atol=1e-5, rtol=1e-5), "tiled path mismatch"

    # Tiled path with a ragged final tile (masked partial-tile reduction).
    x2 = jax.random.normal(kx, (B, C, 12, 12), dtype=jnp.float32)   # HW = 144
    ref2 = eca_reference(x2, conv_weight)
    out2 = jax.block_until_ready(
        eca_layer(x2, conv_weight, force_tiled=True, hw_tile=128))
    assert jnp.allclose(out2, ref2, atol=1e-5, rtol=1e-5), "ragged tile mismatch"

    print("KERNEL_OK")
</pallas_src>

<mosaic_0001>
module attributes {stable_mosaic.version = 11 : i64} {
  func.func @_eca_fused_kernel(%arg0: i32, %arg1: memref<1x16x256xf32, #tpu.memory_space<vmem>>, %arg2: memref<3xf32, #tpu.memory_space<smem>>, %arg3: memref<1x16x256xf32, #tpu.memory_space<vmem>>) attributes {dimension_semantics = [#tpu.dimension_semantics<parallel>], iteration_bounds = array<i64: 2>, scalar_prefetch = 0 : i64, scratch_operands = 0 : i64, tpu.core_type = #tpu.core_type<tc>, window_params = [{transform_indices = @transform_0, window_bounds = array<i64: 1, 16, 256>}, {transform_indices = @transform_1, window_bounds = array<i64: 3>}, {transform_indices = @transform_2, window_bounds = array<i64: 1, 16, 256>}]} {
    %c0 = arith.constant 0 : index
    %c0_0 = arith.constant 0 : index
    %c0_1 = arith.constant 0 : index
    %0 = vector.load %arg1[%c0, %c0_0, %c0_1] : memref<1x16x256xf32, #tpu.memory_space<vmem>>, vector<1x16x256xf32>
    %1 = vector.shape_cast %0 : vector<1x16x256xf32> to vector<16x256xf32>
    %cst = arith.constant dense<0.000000e+00> : vector<16xf32>
    %2 = vector.multi_reduction <add>, %1, %cst [1] : vector<16x256xf32> to vector<16xf32>
    %3 = vector.shape_cast %2 : vector<16xf32> to vector<16x1xf32>
    %cst_2 = arith.constant 3.906250e-03 : f32
    %4 = vector.broadcast %cst_2 : f32 to vector<16x1xf32>
    %5 = arith.mulf %3, %4 : vector<16x1xf32>
    %6 = tpu.iota {dimensions = array<i32: 0>} : vector<16x1xi32>
    %cst_3 = arith.constant 0.000000e+00 : f32
    %7 = vector.broadcast %cst_3 : f32 to vector<16x1xf32>
    %c1_i32 = arith.constant 1 : i32
    %8 = tpu.dynamic_rotate %5 by %c1_i32 dim 0 : vector<16x1xf32>, i32 -> vector<16x1xf32>
    %c-1_i32 = arith.constant -1 : i32
    %9 = vector.broadcast %c-1_i32 : i32 to vector<16x1xi32>
    %10 = arith.addi %6, %9 : vector<16x1xi32>
    %c0_i32 = arith.constant 0 : i32
    %11 = vector.broadcast %c0_i32 : i32 to vector<16x1xi32>
    %12 = arith.cmpi sge, %10, %11 : vector<16x1xi32>
    %c-1_i32_4 = arith.constant -1 : i32
    %13 = vector.broadcast %c-1_i32_4 : i32 to vector<16x1xi32>
    %14 = arith.addi %6, %13 : vector<16x1xi32>
    %c16_i32 = arith.constant 16 : i32
    %15 = vector.broadcast %c16_i32 : i32 to vector<16x1xi32>
    %16 = arith.cmpi slt, %14, %15 : vector<16x1xi32>
    %17 = arith.andi %12, %16 : vector<16x1xi1>
    %c0_5 = arith.constant 0 : index
    %18 = memref.load %arg2[%c0_5] : memref<3xf32, #tpu.memory_space<smem>>
    %cst_6 = arith.constant 0.000000e+00 : f32
    %19 = vector.broadcast %cst_6 : f32 to vector<16x1xf32>
    %20 = arith.select %17, %8, %19 : vector<16x1xi1>, vector<16x1xf32>
    %21 = vector.broadcast %18 : f32 to vector<16x1xf32>
    %22 = arith.mulf %21, %20 : vector<16x1xf32>
    %23 = arith.addf %7, %22 : vector<16x1xf32>
    %c0_i32_7 = arith.constant 0 : i32
    %24 = vector.broadcast %c0_i32_7 : i32 to vector<16x1xi32>
    %25 = arith.addi %6, %24 : vector<16x1xi32>
    %c0_i32_8 = arith.constant 0 : i32
    %26 = vector.broadcast %c0_i32_8 : i32 to vector<16x1xi32>
    %27 = arith.cmpi sge, %25, %26 : vector<16x1xi32>
    %c0_i32_9 = arith.constant 0 : i32
    %28 = vector.broadcast %c0_i32_9 : i32 to vector<16x1xi32>
    %29 = arith.addi %6, %28 : vector<16x1xi32>
    %c16_i32_10 = arith.constant 16 : i32
    %30 = vector.broadcast %c16_i32_10 : i32 to vector<16x1xi32>
    %31 = arith.cmpi slt, %29, %30 : vector<16x1xi32>
    %32 = arith.andi %27, %31 : vector<16x1xi1>
    %c1 = arith.constant 1 : index
    %33 = memref.load %arg2[%c1] : memref<3xf32, #tpu.memory_space<smem>>
    %cst_11 = arith.constant 0.000000e+00 : f32
    %34 = vector.broadcast %cst_11 : f32 to vector<16x1xf32>
    %35 = arith.select %32, %5, %34 : vector<16x1xi1>, vector<16x1xf32>
    %36 = vector.broadcast %33 : f32 to vector<16x1xf32>
    %37 = arith.mulf %36, %35 : vector<16x1xf32>
    %38 = arith.addf %23, %37 : vector<16x1xf32>
    %c15_i32 = arith.constant 15 : i32
    %39 = tpu.dynamic_rotate %5 by %c15_i32 dim 0 : vector<16x1xf32>, i32 -> vector<16x1xf32>
    %c1_i32_12 = arith.constant 1 : i32
    %40 = vector.broadcast %c1_i32_12 : i32 to vector<16x1xi32>
    %41 = arith.addi %6, %40 : vector<16x1xi32>
    %c0_i32_13 = arith.constant 0 : i32
    %42 = vector.broadcast %c0_i32_13 : i32 to vector<16x1xi32>
    %43 = arith.cmpi sge, %41, %42 : vector<16x1xi32>
    %c1_i32_14 = arith.constant 1 : i32
    %44 = vector.broadcast %c1_i32_14 : i32 to vector<16x1xi32>
    %45 = arith.addi %6, %44 : vector<16x1xi32>
    %c16_i32_15 = arith.constant 16 : i32
    %46 = vector.broadcast %c16_i32_15 : i32 to vector<16x1xi32>
    %47 = arith.cmpi slt, %45, %46 : vector<16x1xi32>
    %48 = arith.andi %43, %47 : vector<16x1xi1>
    %c2 = arith.constant 2 : index
    %49 = memref.load %arg2[%c2] : memref<3xf32, #tpu.memory_space<smem>>
    %cst_16 = arith.constant 0.000000e+00 : f32
    %50 = vector.broadcast %cst_16 : f32 to vector<16x1xf32>
    %51 = arith.select %48, %39, %50 : vector<16x1xi1>, vector<16x1xf32>
    %52 = vector.broadcast %49 : f32 to vector<16x1xf32>
    %53 = arith.mulf %52, %51 : vector<16x1xf32>
    %54 = arith.addf %38, %53 : vector<16x1xf32>
    %55 = arith.negf %54 : vector<16x1xf32>
    %56 = math.exp %55 : vector<16x1xf32>
    %cst_17 = arith.constant 1.000000e+00 : f32
    %57 = vector.broadcast %cst_17 : f32 to vector<16x1xf32>
    %58 = arith.addf %57, %56 : vector<16x1xf32>
    %59 = arith.divf %57, %58 : vector<16x1xf32>
    %60 = vector.broadcast %59 : vector<16x1xf32> to vector<16x256xf32>
    %61 = arith.mulf %1, %60 : vector<16x256xf32>
    %c0_18 = arith.constant 0 : index
    %c0_19 = arith.constant 0 : index
    %c0_20 = arith.constant 0 : index
    %62 = vector.load %arg3[%c0_18, %c0_19, %c0_20] : memref<1x16x256xf32, #tpu.memory_space<vmem>>, vector<1x16x256xf32>
    %63 = vector.shape_cast %62 : vector<1x16x256xf32> to vector<16x256xf32>
    %64 = vector.shape_cast %61 : vector<16x256xf32> to vector<1x16x256xf32>
    tpu.vector_store %arg3[%c0_18, %c0_19, %c0_20], %64 {strides = array<i32>} : memref<1x16x256xf32, #tpu.memory_space<vmem>>, vector<1x16x256xf32>,
    return
  }
  func.func @transform_0(%arg0: i32) -> (i32, i32, i32) {
    %c0_i32 = arith.constant 0 : i32
    %c0_i32_0 = arith.constant 0 : i32
    %c0_i32_1 = arith.constant 0 : i32
    return %arg0, %c0_i32, %c0_i32_0 : i32, i32, i32
  }
  func.func @transform_1(%arg0: i32) -> i32 {
    %c0_i32 = arith.constant 0 : i32
    %c0_i32_0 = arith.constant 0 : i32
    return %c0_i32 : i32
  }
  func.func @transform_2(%arg0: i32) -> (i32, i32, i32) {
    %c0_i32 = arith.constant 0 : i32
    %c0_i32_0 = arith.constant 0 : i32
    %c0_i32_1 = arith.constant 0 : i32
    return %arg0, %c0_i32, %c0_i32_0 : i32, i32, i32
  }
}

</mosaic_0001>

<bundles_post_ra>
// kernel: tpu_custom_call.1
= control target key start
LH: loop header
LB: loop body
LE: loop exit
PB: predicated region body
PF: predicated region fallthrough
CT: control target
= control target key end

     0   :  { %7 = vsyncpa [#allocation3], 0  ;;  %s819_s0 = inlined_call_operand.hbm [shape: f32[2,16,256], index: 0, kind: input, shape index: {}]   ;;  %s820_s1 = inlined_call_operand.vmem [shape: f32[3], index: 1, kind: input, shape index: {}]   ;;  %s821_s2 = inlined_call_operand.hbm [shape: f32[2,16,256], index: 2, kind: output, shape index: {}]  }
   0x1   :  { %9 = vsyncpa [#allocation3 + $0x1], 0 }
   0x2   :  { %10 = vsyncpa [#allocation5], 0 }
   0x3   :  { %11 = vsyncpa [#allocation4], 0 }
   0x4   :  { %13 = vsyncpa [#allocation4 + $0x1], 0  ;;  %s610_s9 = smov 0   ;;  %s612_s10 = smov 0  }
   0x5   :  { %s614_s11 = smov 0   ;;  %s616_s12 = smov 0  }
   0x6 LB: > { %s631_s13 = sadd.s32 4294967295, %s585_s12   ;;  %s376_s14 = sadd.s32 4294967294, %s585_s12   ;;  %s585_s12 = sphi %s616_s12, %s841_s12   ;;  %s581_s11 = sphi %s614_s11, %s840_s11   ;;  %s577_s10 = sphi %s612_s10, %s839_s10   ;;  %s573_s9 = sphi %s610_s9, %s838_s9  }
   0x7   : > { %s635_s15 = sadd.s32 1, %s585_s12   ;;  %s26_s16 = sadd.s32 1, %s581_s11 }
   0x8   : > { %s23_s17 = ssub.s32 %s585_s12, %s635_s15  ;;  %p33_p0 = scmp.ne.s32.totalorder %s581_s11, %s577_s10 }
   0x9   : > { %p24_p1 = scmp.eq.s32.totalorder %s23_s17, 0  ;;  %p34_p2 = scmp.eq.s32.totalorder %s585_s12, 0 }
   0xa   : > { %p39_p3 = scmp.ne.s32.totalorder %s577_s10, %s573_s9  ;;  %p823_p4 = scmp.eq.s32.totalorder %s631_s13, 0 }
   0xb   : > { %s647_s18 = scalar_select %p24_p1, %s581_s11, %s26_s16  }
   0xc   : > { %p649_p5 = por %p34_p2, %p33_p0  ;;  %p655_p6 = por %p823_p4, %p39_p3 }
   0xd   : > { %p84_p7 = scmp.eq.s32.totalorder %s631_s13, 1  ;;  %p90_p8 = scmp.eq.s32.totalorder %s376_s14, 1 }
   0xe   : > { %s826_s20 = scalar_select %p655_p6, 1, 0 }
   0xf   : > { %p377_p9 = scmp.ge.s32.totalorder %s585_s12, 1  ;;  %p97_p10 = scmp.lt.s32.totalorder %s585_s12, 3 }
  0x10   : > { %p662_p11 = por %p84_p7, %p33_p0  ;;  %p666_p12 = por %p90_p8, %p39_p3 }
  0x11   : > { %p670_p13 = pnand %p377_p9, %p97_p10  ;;  %s110_s26 = sshll.u32 %s820_s1, 4  ;;  %s111_s26 = int_to_ptr.vmem [resolvable:$true] %s110_s26 }
  0x12   : > { %s827_s21 = scalar_select %p662_p11, 1, 0 }
  0x13   : > { %s828_s22 = scalar_select %p666_p12, 1, 0 }
  0x14   : > { %p406_p1 = pneg %p670_p13  ;;  %p419_p2 = scmp.lt.s32.totalorder %s585_s12, 2 }
  0x15   : > { %s121_s28 = sand.u32 1, %s581_s11   ;;  %s470_s3 = scalar_lea.vmem %s111_s26, 16 }
  0x16   : > { %p683_p7 = pnand %p406_p1, %p823_p4  ;;  %p690_p3 = pnand %p419_p2, %p649_p5 }
  0x17   : > { %s380_s30 = sshll.u32 %s121_s28, 5  ;;  %p471_p8 = scmp.ne.s32.totalorder %s111_s26, %s470_s3 }
  0x18   : > { %p472_p9 = pneg %p683_p7  ;;  %p478_p12 = scmp.lt.s32.totalorder %s111_s26, %s111_s26 }
  0x19   : > { %p479_p11 = scmp.lt.s32.totalorder %s470_s3, %s470_s3 }
  0x1a   : > { %p473_p10 = pnand %p472_p9, %p471_p8 }
  0x1b   : > { %p480_p1 = por %p479_p11, %p478_p12 }
  0x1c   : > { %p474_p0 = pneg %p473_p10 }
  0x1e   : > { %p481_p4 = pnand %p480_p1, %p474_p0 }
  0x20   : > { %484 = shalt.err (!%p481_p4)
}
  0x21   : > { %s587_s4 = smov [#allocation6]   ;;  %s396_s5 = sshll.u32 %s585_s12, 9 }
  0x22   : > { %409 = dma.vmem_to_smem (!%p683_p7), %s111_s26, 16, %s587_s4, [#allocation5]  }
  0x23   : > { %s125_s6 = scalar_lea.vmem [#allocation2], %s380_s30  ;;  %s702_s16 = scalar_lea.hbm %s819_s0, %s396_s5 }
  0x24   : > { %s132_s7 = sshll.u32 %s125_s6, 4  ;;  %s706_s17 = scalar_lea.sflag [#allocation3], %s121_s28  ;;  %s704_s7 = int_to_ptr.vmem [resolvable:$true] %s132_s7 }
  0x25   : > { %s485_s19 = scalar_lea.hbm %s702_s16, 512  ;;  %p487_p5 = pneg %p690_p3 }
  0x26   : > { %p486_p4 = scmp.ne.s32.totalorder %s702_s16, %s485_s19  ;;  %s490_s26 = scalar_lea.hbm %s819_s0, 1024 }
  0x27   : > { %p491_p0 = scmp.lt.u32.totalorder %s702_s16, %s819_s0  ;;  %p492_p2 = scmp.lt.u32.totalorder %s490_s26, %s485_s19 }
  0x28   : > { %p488_p11 = pnand %p487_p5, %p486_p4  ;;  %p494_p8 = scmp.lt.u32.totalorder %s485_s19, %s702_s16 }
  0x29   : > { %p493_p7 = por %p492_p2, %p491_p0 }
  0x2a   : > { %p489_p12 = pneg %p488_p11 }
  0x2b   : > { %p495_p9 = por %p494_p8, %p493_p7 }
  0x2d   : > { %p496_p10 = pnand %p495_p9, %p489_p12 }
  0x2f   : > { %499 = shalt.err (!%p496_p10)
}
  0x30   : > { %s500_s28 = scalar_lea.vmem %s704_s7, 512  ;;  %s588_s3 = smov [#allocation2]  }
  0x31   : > { %p501_p1 = scmp.ne.s32.totalorder %s704_s7, %s500_s28  ;;  %s505_s4 = sshll.u32 %s588_s3, 4  ;;  %s506_s4 = int_to_ptr.vmem [resolvable:$false] %s505_s4 }
  0x32   : > { %s507_s5 = scalar_lea.vmem %s506_s4, 1024  ;;  %p508_p6 = scmp.lt.s32.totalorder %s704_s7, %s506_s4 }
  0x33   : > { %p503_p4 = pnand %p501_p1, %p487_p5  ;;  %p509_p0 = scmp.lt.s32.totalorder %s507_s5, %s500_s28 }
  0x35   : > { %p504_p11 = pneg %p503_p4  ;;  %p510_p2 = por %p509_p0, %p508_p6 }
  0x37   : > { %p511_p7 = pnand %p510_p2, %p504_p11 }
  0x39   : > { %514 = shalt.err (!%p511_p7)
}
  0x3a   : > { %s589_s6 = smov 256   ;;  %s590_s8 = smov 16  }
  0x3b   : > { %413 = dma.hbm_to_vmem [thread:$0]  (!%p690_p3), %s702_s16, 512, %s704_s7, %s706_s17, %s589_s6, %s589_s6, %s590_s8  }
  0x3c   : > { %144 = sbr.rel (%p670_p13) target bundleno = 410 (0x19a), region = 28  ;;  %s737_s14 = sand.u32 (!%p670_p13), 1, %s577_s10  }
  0x3d   : > { %s384_s19 = sshll.u32 (!%p670_p13), %s737_s14, 5  ;;  %s147_s24 = scalar_lea.sflag (!%p670_p13), [#allocation3], %s737_s14 }
  0x3e   : > { %s150_s25 = scalar_lea.vmem (!%p670_p13), [#allocation2], %s384_s19  ;;  %p832_p6 = scmp.ne.s32.totalorder (!%p670_p13), %s826_s20, 0 }
  0x43   : > { %560 = dma.done.wait (%p832_p6), %s147_s24, 512  }
  0x44   : > { %562 = vsyncadd (%p832_p6), %s147_s24, 4294966784  ;;  %p833_p3 = scmp.eq.s32.totalorder %s631_s13, 0 }
  0x46   : > { %564 = dma.done.wait (%p833_p3), [#allocation5], 16   ;;  %p834_p13 = pmov %p833_p3 }
  0x48   : > { %566 = vsyncadd (%p834_p13), [#allocation5], 4294967280 }
  0x49   : > { %159 = sfence }
  0x4a   : > { %v751_v0 = vld [vmem:[%s150_s25] sm:$0xff]  ;;  %v753_v1 = vld [vmem:[%s150_s25 + $0x8] sm:$0xff]  ;;  %v755_v2 = vld [vmem:[%s150_s25 + $0x10] sm:$0xff]  ;;  %v591_v6 = vmov 0   ;;  %v188_v7 = vlaneseq  ;;  %s204_s20 = sld [smem:[#allocation6]]  ;;  %s387_s23 = sld [smem:[#allocation6 + $0x1]] }
  0x4b   : > { %v180_v3 = vadd.f32 %v753_v1, %v751_v0  ;;  %v759_v4 = vld [vmem:[%s150_s25 + $0x18] sm:$0xff]  ;;  %460 = vset.pattern.permute.xlu1 %v591_v6  ;;  %461 = vset.pattern.permute.xlu0 %v591_v6  ;;  %s388_s29 = sld [smem:[#allocation6 + $0x2]]  ;;  %s175_s7 = scalar_lea.vmem [#allocation7], %s384_s19 }
  0x4c   : > { %v183_v5 = vadd.f32 %v759_v4, %v755_v2  ;;  %v189_v8 = vshrl.u32 %v188_v7, 7  ;;  %s291_s16 = sshll.u32 %s175_s7, 4  ;;  %s397_s17 = sshll.u32 %s631_s13, 9  ;;  %s768_s16 = int_to_ptr.vmem [resolvable:$true] %s291_s16 }
  0x4d   : > { %181 = vadd.xlane.f32.xlu0 %v180_v3  ;;  %s773_s30 = scalar_lea.hbm %s821_s2, %s397_s17  ;;  %s278_s13 = scalar_lea.sflag [#allocation4], %s737_s14 }
  0x4e   : > { %v190_v9 = vadd.s32 8, %v189_v8  ;;  %v196_v11 = vadd.s32 4294967295, %v189_v8  ;;  %vm193_vm0 = vcmp.lt.s32.totalorder %v189_v8, 1  ;;  %vm228_vm2 = vcmp.lt.s32.totalorder %v189_v8, 7  ;;  %s515_s28 = scalar_lea.vmem %s768_s16, 512  ;;  %p835_p12 = scmp.ne.s32.totalorder %s827_s21, 0 }
  0x4f   : > { %p516_p5 = scmp.ne.s32.totalorder %s768_s16, %s515_s28  ;;  %s592_s3 = smov [#allocation7]  }
  0x50   : > { %v232_v12 = vadd.s32 1, %v190_v9  ;;  %vm198_vm1 = vcmp.ge.s32.totalorder %v196_v11, 0  ;;  %v207_v16 = vstv %s204_s20  ;;  %v221_v21 = vstv %s387_s23  ;;  %s519_s4 = sshll.u32 %s592_s3, 4  ;;  %s520_s4 = int_to_ptr.vmem [resolvable:$false] %s519_s4 }
  0x51   : > { %184 = vadd.xlane.f32.xlu0 %v183_v5  ;;  %v242_v22 = vstv %s388_s29  ;;  %p517_p8 = pnand %p516_p5, %p835_p12  ;;  %s521_s5 = scalar_lea.vmem %s520_s4, 1024 }
  0x52   : > { %vm236_vm3 = vcmp.lt.s32.totalorder %v232_v12, 16  ;;  %p522_p10 = scmp.lt.s32.totalorder %s768_s16, %s520_s4  ;;  %p523_p1 = scmp.lt.s32.totalorder %s521_s5, %s515_s28 }
  0x53   : > { %p518_p9 = pneg %p517_p8 }
  0x54   : > { %p524_p4 = por %p523_p1, %p522_p10 }
  0x56   : > { %p525_p11 = pnand %p524_p4, %p518_p9 }
  0xda   : > { %v182_v10 = vpop.xlane.xlu0 %181 }
  0xdb   : > { %v186_v13 = vmul.f32 0.00390625, %v182_v10 }
  0xdd   : > { %v191_v17 = vrot.slane %v186_v13, 7  ;;  %v226_v18 = vrot.slane %v186_v13, 1  ;;  %v222_v31 = vmul.f32 %v221_v21, %v186_v13 }
  0xde   : > { %v185_v14 = vpop.xlane.xlu0 %184 }
  0xdf   : > { %v187_v15 = vmul.f32 0.00390625, %v185_v14 }
  0xe1   : > { %v192_v19 = vrot.slane %v187_v15, 7  ;;  %v227_v20 = vrot.slane %v187_v15, 1  ;;  %v223_v25 = vmul.f32 %v221_v21, %v187_v15 }
  0xe3   : > { %v194_v23 = vsel %vm193_vm0, %v191_v17, %v192_v19  ;;  %v195_v24 = vsel %vm193_vm0, %v192_v19, %v191_v17  ;;  %v230_v26 = vsel %vm228_vm2, %v227_v20, %v226_v18  ;;  %v229_v29 = vsel %vm228_vm2, %v226_v18, %v227_v20 }
  0xe4   : > { %v205_v27 = vsel %vm198_vm1, %v195_v24, 0.0  ;;  %v209_v28 = vmul.f32 %v207_v16, %v194_v23  ;;  %v241_v30 = vsel %vm236_vm3, %v230_v26, 0.0  ;;  %v243_v36 = vmul.f32 %v242_v22, %v229_v29 }
  0xe5   : > { %v208_v32 = vmul.f32 %v207_v16, %v205_v27  ;;  %v244_v33 = vmul.f32 %v242_v22, %v241_v30 }
  0xe6   : > { %v225_v34 = vadd.f32 %v223_v25, %v209_v28 }
  0xe7   : > { %v224_v35 = vadd.f32 %v222_v31, %v208_v32 }
  0xe8   : > { %v246_v37 = vadd.f32 %v244_v33, %v225_v34 }
  0xe9   : > { %v245_v38 = vadd.f32 %v243_v36, %v224_v35 }
  0xea   : > { %v390_v39 = vmul.f32 -1.442695, %v246_v37 }
  0xeb   : > { %v389_v40 = vmul.f32 -1.442695, %v245_v38 }
  0xec   : > { %462 = vpow2.f32 %v390_v39 }
  0xed   : > { %464 = vpow2.f32 %v389_v40 }
  0xf6   : > { %v463_v41 = vpop.eup %462 }
  0xf7   : > { %v465_v42 = vpop.eup %464  ;;  %v254_v44 = vadd.f32 1.0, %v463_v41 }
  0xf8   : > { %v253_v43 = vadd.f32 1.0, %v465_v42 }
  0xfa   : > { %466 = vrcp.f32 %v253_v43 }
  0xfb   : > { %468 = vrcp.f32 %v254_v44 }
 0x104   : > { %v467_v45 = vpop.eup %466 }
 0x105   : > { %261 = vperm.xlu1 %460, %v467_v45   ;;  %v469_v46 = vpop.eup %468 }
 0x109   : > { %266 = vperm.xlu1 %460, %v469_v46  }
 0x184   : > { %v262_v47 = vpop.permute.xlu1 %261 }
 0x185   : > { %v269_v48 = vmul.f32 %v262_v47, %v751_v0  ;;  %v270_v49 = vmul.f32 %v262_v47, %v753_v1 }
 0x187   : > { %273 = vst [vmem:[%s175_s7] sm:$0xff] %v269_v48  ;;  %274 = vst [vmem:[%s175_s7 + $0x8] sm:$0xff] %v270_v49 }
 0x188   : > { %v267_v50 = vpop.permute.xlu1 %266 }
 0x189   : > { %v271_v51 = vmul.f32 %v267_v50, %v755_v2  ;;  %v272_v52 = vmul.f32 %v267_v50, %v759_v4 }
 0x18b   : > { %275 = vst [vmem:[%s175_s7 + $0x10] sm:$0xff] %v271_v51  ;;  %276 = vst [vmem:[%s175_s7 + $0x18] sm:$0xff] %v272_v52 }
 0x18c   : > { %528 = shalt.err (!%p525_p11)
}
 0x18d   : > { %s529_s6 = scalar_lea.hbm %s773_s30, 512  ;;  %s533_s24 = scalar_lea.hbm %s821_s2, 1024 }
 0x18e   : > { %p530_p0 = scmp.ne.s32.totalorder %s773_s30, %s529_s6  ;;  %p534_p6 = scmp.lt.u32.totalorder %s773_s30, %s821_s2 }
 0x18f   : > { %p535_p3 = scmp.lt.u32.totalorder %s533_s24, %s529_s6  ;;  %p537_p5 = scmp.lt.u32.totalorder %s529_s6, %s773_s30 }
 0x190   : > { %p531_p2 = pnand %p530_p0, %p835_p12 }
 0x191   : > { %p536_p13 = por %p535_p3, %p534_p6 }
 0x192   : > { %p532_p7 = pneg %p531_p2 }
 0x193   : > { %p538_p8 = por %p537_p5, %p536_p13 }
 0x195   : > { %p539_p9 = pnand %p538_p8, %p532_p7 }
 0x197   : > { %542 = shalt.err (!%p539_p9)
}
 0x198   : > { %s593_s23 = smov 256   ;;  %s594_s29 = smov 16  }
 0x199   : > { %404 = dma.vmem_to_hbm [thread:$0]  (%p835_p12), %s768_s16, 512, %s773_s30, %s278_s13, %s593_s23, %s593_s23, %s594_s29  }
 0x19a PF: > { %s306_s7 = sand.u32 1, %s573_s9   ;;  %p836_p10 = scmp.ne.s32.totalorder %s828_s22, 0 }
 0x19b   : > { %p837_p1 = scmp.ge.s32.totalorder %s585_s12, 2  ;;  %s307_s17 = scalar_lea.sflag [#allocation4], %s306_s7 }
 0x19d   : > { %p415_p4 = pnand %p837_p1, %p836_p10 }
 0x19f   : > { %568 = dma.done.wait (!%p415_p4), %s307_s17, 512  }
 0x1a0   : > { %570 = vsyncadd (!%p415_p4), %s307_s17, 4294966784  ;;  %p16_p11 = scmp.ge.s32.totalorder %s635_s15, 4   ;;  %s838_s9 = smov %s577_s10 }
 0x1a1   : > { %s839_s10 = smov %s581_s11  ;;  %s840_s11 = smov %s647_s18 }
 0x1a2   : > { %s841_s12 = smov %s635_s15  ;;  %18 = sbr.rel (!%p16_p11) target bundleno = 6 (0x6), region = 78 }
 0x1a9   :  { %312 = vsyncpa [#allocation3], 1 }
 0x1aa   :  { %314 = vsyncpa [#allocation3 + $0x1], 1 }
 0x1ab   :  { %315 = vsyncpa [#allocation4], 1 }
 0x1ac   :  { %317 = vsyncpa [#allocation4 + $0x1], 1 }
 0x1ad   :  { %318 = vsyncpa [#allocation5], 1 }
 0x1ae   :  { %320 = vsyncpa [#allocation5 + $0x1], 1 }

</bundles_post_ra>
